<compile_context>
chip_gen: v7x
topology: tpu7x:2x2x1
jax: 0.10.0
libtpu: 0.0.40
codegen_flags: <defaults>
</compile_context>

<pallas_src>
import functools

import jax
import jax.numpy as jnp
from jax.experimental import pallas as pl
from jax.experimental.pallas import tpu as pltpu


def _round_up(x, m):
    return (x + m - 1) // m * m


def ffn_kernel(x_ref, w1_ref, b1_ref, w2_ref, b2_ref, o_ref, acc_ref):
    k = pl.program_id(1)

    @pl.when(k == 0)
    def _():
        acc_ref[...] = jnp.zeros_like(acc_ref)

    # First matmul chunk: (tb, in_pad) @ (in_pad, tk) -> (tb, tk), f32 accumulate.
    h = jnp.dot(x_ref[...], w1_ref[...], preferred_element_type=jnp.float32)
    # Per-hidden-unit bias + ReLU (safe to apply per K chunk).
    h = jnp.maximum(h + b1_ref[...], 0.0)
    # Second matmul chunk accumulates into the resident f32 accumulator.
    acc_ref[...] += jnp.dot(h.astype(w2_ref.dtype), w2_ref[...],
                            preferred_element_type=jnp.float32)

    @pl.when(k == pl.num_programs(1) - 1)
    def _():
        o_ref[...] = (acc_ref[...] + b2_ref[...]).astype(o_ref.dtype)


def _pad2(a, rows, cols):
    pr, pc = rows - a.shape[0], cols - a.shape[1]
    if pr == 0 and pc == 0:
        return a
    return jnp.pad(a, ((0, pr), (0, pc)))


@functools.partial(jax.jit, static_argnames=("tb", "tk", "compute_dtype"))
def ffn_forward(x, w1, b1, w2, b2, *, tb=256, tk=512, compute_dtype=jnp.bfloat16):
    """x: (N, in_feat); w1: (in_feat, hid); b1: (1, hid); w2: (hid, out); b2: (1, out).

    Computes  relu(x @ w1 + b1) @ w2 + b2  (dropout = eval identity) with bf16
    MXU inputs and f32 accumulation.
    """
    n, in_feat = x.shape
    hid_feat = w1.shape[1]
    out_feat = w2.shape[1]
    out_dtype = x.dtype

    # --- lane/sublane aligned padded sizes ------------------------------------
    in_pad = _round_up(in_feat, 128)                 # contraction dim of matmul 1
    out_pad = _round_up(out_feat, 128)               # lane-dense output
    tk = max(128, min(_round_up(tk, 128), _round_up(hid_feat, 128)))
    hid_pad = _round_up(hid_feat, tk)                # hidden dim, tiled by tk
    tb = max(16, min(tb, _round_up(n, 16)))          # bf16 needs 16-row multiples
    n_pad = _round_up(n, tb)

    # --- pad + cast operands (zero padding keeps the math exact) --------------
    xp = _pad2(x, n_pad, in_pad).astype(compute_dtype)
    w1p = _pad2(w1, in_pad, hid_pad).astype(compute_dtype)
    b1p = _pad2(b1, 1, hid_pad).astype(jnp.float32)
    w2p = _pad2(w2, hid_pad, out_pad).astype(compute_dtype)
    b2p = _pad2(b2, 1, out_pad).astype(jnp.float32)

    grid = (n_pad // tb, hid_pad // tk)

    # --- VMEM budget (double-buffered blocks + f32 accumulator scratch) -------
    cb = jnp.dtype(compute_dtype).itemsize
    ob = jnp.dtype(out_dtype).itemsize
    needed = (2 * tb * in_pad * cb          # x tile
              + 2 * in_pad * tk * cb        # W1 slab
              + 2 * tk * 4                  # b1
              + 2 * tk * out_pad * cb       # W2 slab
              + 2 * out_pad * 4             # b2
              + 2 * tb * out_pad * ob       # output tile
              + tb * out_pad * 4)           # accumulator scratch
    vmem_limit = min(int(needed * 1.5) + (2 << 20), 110 << 20)

    out_padded = pl.pallas_call(
        ffn_kernel,
        out_shape=jax.ShapeDtypeStruct((n_pad, out_pad), out_dtype),
        grid_spec=pltpu.PrefetchScalarGridSpec(
            num_scalar_prefetch=0,
            grid=grid,
            in_specs=[
                pl.BlockSpec((tb, in_pad), lambda i, k: (i, 0)),     # x tile (resident over k)
                pl.BlockSpec((in_pad, tk), lambda i, k: (0, k)),     # W1 K-slab
                pl.BlockSpec((1, tk), lambda i, k: (0, k)),          # b1 K-slab
                pl.BlockSpec((tk, out_pad), lambda i, k: (k, 0)),    # W2 K-slab
                pl.BlockSpec((1, out_pad), lambda i, k: (0, 0)),     # b2 (constant)
            ],
            out_specs=pl.BlockSpec((tb, out_pad), lambda i, k: (i, 0)),
            scratch_shapes=[pltpu.VMEM((tb, out_pad), jnp.float32)],
        ),
        compiler_params=pltpu.CompilerParams(
            dimension_semantics=("parallel", "arbitrary"),
            vmem_limit_bytes=vmem_limit,
        ),
    )(xp, w1p, b1p, w2p, b2p)

    return out_padded[:n, :out_feat]


def init_ffn_params(key, in_feat, out_feat, dtype=jnp.float32):
    # Deterministic init mimicking PyTorch nn.Linear default U(-1/sqrt(fan_in), +).
    k1, k2, k3, k4 = jax.random.split(key, 4)
    bound1 = 1.0 / jnp.sqrt(in_feat)
    w1 = jax.random.uniform(k1, (in_feat, in_feat), dtype, -bound1, bound1)
    b1 = jax.random.uniform(k2, (1, in_feat), dtype, -bound1, bound1)
    bound2 = 1.0 / jnp.sqrt(in_feat)
    w2 = jax.random.uniform(k3, (in_feat, out_feat), dtype, -bound2, bound2)
    b2 = jax.random.uniform(k4, (1, out_feat), dtype, -bound2, bound2)
    return w1, b1, w2, b2


if __name__ == "__main__":
    key = jax.random.PRNGKey(0)
    k_x, k_p = jax.random.split(key)

    batch, in_feat, out_feat = 16, 32, 24
    x = jax.random.normal(k_x, (batch, in_feat), jnp.float32)
    w1, b1, w2, b2 = init_ffn_params(k_p, in_feat, out_feat)

    out = ffn_forward(x, w1, b1, w2, b2)
    out = jax.block_until_ready(out)

    # Reference with the same bf16-multiply / f32-accumulate recipe
    # (dropout = eval-mode identity).
    xb, w1b, w2b = (a.astype(jnp.bfloat16) for a in (x, w1, w2))
    h_ref = jnp.maximum(
        jnp.dot(xb, w1b, preferred_element_type=jnp.float32) + b1, 0.0)
    ref = jnp.dot(h_ref.astype(jnp.bfloat16), w2b,
                  preferred_element_type=jnp.float32) + b2

    assert out.shape == (batch, out_feat)
    assert jnp.allclose(out, ref, atol=1e-3, rtol=1e-3), (
        float(jnp.max(jnp.abs(out - ref))))

    print("KERNEL_OK")
</pallas_src>

<mosaic_0001>
module attributes {stable_mosaic.version = 11 : i64} {
  func.func @ffn_kernel(%arg0: i32, %arg1: i32, %arg2: memref<16x128xbf16, #tpu.memory_space<vmem>>, %arg3: memref<128x128xbf16, #tpu.memory_space<vmem>>, %arg4: memref<1x128xf32, #tpu.memory_space<vmem>>, %arg5: memref<128x128xbf16, #tpu.memory_space<vmem>>, %arg6: memref<1x128xf32, #tpu.memory_space<vmem>>, %arg7: memref<16x128xf32, #tpu.memory_space<vmem>>, %arg8: memref<16x128xf32, #tpu.memory_space<vmem>>) attributes {dimension_semantics = [#tpu.dimension_semantics<parallel>, #tpu.dimension_semantics<arbitrary>], iteration_bounds = array<i64: 1, 1>, scalar_prefetch = 0 : i64, scratch_operands = 1 : i64, tpu.core_type = #tpu.core_type<tc>, window_params = [{transform_indices = @transform_0, window_bounds = array<i64: 16, 128>}, {transform_indices = @transform_1, window_bounds = array<i64: 128, 128>}, {transform_indices = @transform_2, window_bounds = array<i64: 1, 128>}, {transform_indices = @transform_3, window_bounds = array<i64: 128, 128>}, {pipeline_mode = #tpu.pipeline_mode<synchronous>, transform_indices = @transform_4, window_bounds = array<i64: 1, 128>}, {transform_indices = @transform_5, window_bounds = array<i64: 16, 128>}]} {
    %c0_i32 = arith.constant 0 : i32
    %0 = arith.cmpi eq, %arg1, %c0_i32 : i32
    %1 = arith.extui %0 : i1 to i32
    %c0_i32_0 = arith.constant 0 : i32
    %2 = arith.cmpi ne, %1, %c0_i32_0 : i32
    scf.if %2 {
      %cst_16 = arith.constant 0.000000e+00 : f32
      %20 = vector.broadcast %cst_16 : f32 to vector<16x128xf32>
      %c0_17 = arith.constant 0 : index
      %c0_18 = arith.constant 0 : index
      %21 = vector.load %arg8[%c0_17, %c0_18] : memref<16x128xf32, #tpu.memory_space<vmem>>, vector<16x128xf32>
      tpu.vector_store %arg8[%c0_17, %c0_18], %20 {strides = array<i32>} : memref<16x128xf32, #tpu.memory_space<vmem>>, vector<16x128xf32>,
    } else {
    }
    %c0 = arith.constant 0 : index
    %c0_1 = arith.constant 0 : index
    %3 = vector.load %arg2[%c0, %c0_1] : memref<16x128xbf16, #tpu.memory_space<vmem>>, vector<16x128xbf16>
    %c0_2 = arith.constant 0 : index
    %c0_3 = arith.constant 0 : index
    %4 = vector.load %arg3[%c0_2, %c0_3] : memref<128x128xbf16, #tpu.memory_space<vmem>>, vector<128x128xbf16>
    %cst = arith.constant dense<0.000000e+00> : vector<16x128xf32>
    %5 = tpu.matmul %3, %4, %cst {dimension_numbers = #tpu.dot_dimension_numbers<[1], [0], [0], [1], [0, 0, 1, 1], [], []>} : vector<16x128xbf16>, vector<128x128xbf16>, vector<16x128xf32> -> vector<16x128xf32>
    %c0_4 = arith.constant 0 : index
    %c0_5 = arith.constant 0 : index
    %6 = vector.load %arg4[%c0_4, %c0_5] : memref<1x128xf32, #tpu.memory_space<vmem>>, vector<1x128xf32>
    %7 = vector.broadcast %6 : vector<1x128xf32> to vector<16x128xf32>
    %8 = arith.addf %5, %7 : vector<16x128xf32>
    %cst_6 = arith.constant 0.000000e+00 : f32
    %9 = vector.broadcast %cst_6 : f32 to vector<16x128xf32>
    %10 = arith.maximumf %8, %9 : vector<16x128xf32>
    %c0_7 = arith.constant 0 : index
    %c0_8 = arith.constant 0 : index
    %11 = vector.load %arg8[%c0_7, %c0_8] : memref<16x128xf32, #tpu.memory_space<vmem>>, vector<16x128xf32>
    %12 = arith.truncf %10 : vector<16x128xf32> to vector<16x128xbf16>
    %c0_9 = arith.constant 0 : index
    %c0_10 = arith.constant 0 : index
    %13 = vector.load %arg5[%c0_9, %c0_10] : memref<128x128xbf16, #tpu.memory_space<vmem>>, vector<128x128xbf16>
    %cst_11 = arith.constant dense<0.000000e+00> : vector<16x128xf32>
    %14 = tpu.matmul %12, %13, %cst_11 {dimension_numbers = #tpu.dot_dimension_numbers<[1], [0], [0], [1], [0, 0, 1, 1], [], []>} : vector<16x128xbf16>, vector<128x128xbf16>, vector<16x128xf32> -> vector<16x128xf32>
    %15 = arith.addf %11, %14 : vector<16x128xf32>
    %c0_12 = arith.constant 0 : index
    %c0_13 = arith.constant 0 : index
    %16 = vector.load %arg8[%c0_12, %c0_13] : memref<16x128xf32, #tpu.memory_space<vmem>>, vector<16x128xf32>
    tpu.vector_store %arg8[%c0_12, %c0_13], %15 {strides = array<i32>} : memref<16x128xf32, #tpu.memory_space<vmem>>, vector<16x128xf32>,
    %c0_i32_14 = arith.constant 0 : i32
    %17 = arith.cmpi eq, %arg1, %c0_i32_14 : i32
    %18 = arith.extui %17 : i1 to i32
    %c0_i32_15 = arith.constant 0 : i32
    %19 = arith.cmpi ne, %18, %c0_i32_15 : i32
    scf.if %19 {
      %c0_16 = arith.constant 0 : index
      %c0_17 = arith.constant 0 : index
      %20 = vector.load %arg8[%c0_16, %c0_17] : memref<16x128xf32, #tpu.memory_space<vmem>>, vector<16x128xf32>
      %c0_18 = arith.constant 0 : index
      %c0_19 = arith.constant 0 : index
      %21 = vector.load %arg6[%c0_18, %c0_19] : memref<1x128xf32, #tpu.memory_space<vmem>>, vector<1x128xf32>
      %22 = vector.broadcast %21 : vector<1x128xf32> to vector<16x128xf32>
      %23 = arith.addf %20, %22 : vector<16x128xf32>
      %c0_20 = arith.constant 0 : index
      %c0_21 = arith.constant 0 : index
      %24 = vector.load %arg7[%c0_20, %c0_21] : memref<16x128xf32, #tpu.memory_space<vmem>>, vector<16x128xf32>
      tpu.vector_store %arg7[%c0_20, %c0_21], %23 {strides = array<i32>} : memref<16x128xf32, #tpu.memory_space<vmem>>, vector<16x128xf32>,
    } else {
    }
    return
  }
  func.func @transform_0(%arg0: i32, %arg1: i32) -> (i32, i32) {
    %c0_i32 = arith.constant 0 : i32
    %c0_i32_0 = arith.constant 0 : i32
    return %arg0, %c0_i32 : i32, i32
  }
  func.func @transform_1(%arg0: i32, %arg1: i32) -> (i32, i32) {
    %c0_i32 = arith.constant 0 : i32
    %c0_i32_0 = arith.constant 0 : i32
    return %c0_i32, %arg1 : i32, i32
  }
  func.func @transform_2(%arg0: i32, %arg1: i32) -> (i32, i32) {
    %c0_i32 = arith.constant 0 : i32
    %c0_i32_0 = arith.constant 0 : i32
    return %c0_i32, %arg1 : i32, i32
  }
  func.func @transform_3(%arg0: i32, %arg1: i32) -> (i32, i32) {
    %c0_i32 = arith.constant 0 : i32
    %c0_i32_0 = arith.constant 0 : i32
    return %arg1, %c0_i32 : i32, i32
  }
  func.func @transform_4(%arg0: i32, %arg1: i32) -> (i32, i32) {
    %c0_i32 = arith.constant 0 : i32
    %c0_i32_0 = arith.constant 0 : i32
    %c0_i32_1 = arith.constant 0 : i32
    return %c0_i32, %c0_i32_0 : i32, i32
  }
  func.func @transform_5(%arg0: i32, %arg1: i32) -> (i32, i32) {
    %c0_i32 = arith.constant 0 : i32
    %c0_i32_0 = arith.constant 0 : i32
    return %arg0, %c0_i32 : i32, i32
  }
}

</mosaic_0001>

<bundles_post_ra>
// kernel: ffn_forward.1
= control target key start
LH: loop header
LB: loop body
LE: loop exit
PB: predicated region body
PF: predicated region fallthrough
CT: control target
= control target key end

     0   :  { %v417_v1 = vmov 0.0   ;;  %vm418_vm0 = vmmov 0   ;;  %s521_s0 = inlined_call_operand.vmem [shape: bf16[16,128], index: 0, kind: input, shape index: {}]   ;;  %s522_s1 = inlined_call_operand.vmem [shape: bf16[128,128], index: 1, kind: input, shape index: {}]   ;;  %s523_s2 = inlined_call_operand.vmem [shape: f32[1,128], index: 2, kind: input, shape index: {}]   ;;  %s524_s3 = inlined_call_operand.vmem [shape: bf16[128,128], index: 3, kind: input, shape index: {}]   ;;  %s525_s4 = inlined_call_operand.vmem [shape: f32[1,128], index: 4, kind: input, shape index: {}]   ;;  %s526_s5 = inlined_call_operand.hbm [shape: f32[16,128], index: 5, kind: output, shape index: {}]  }
   0x1   :  { %v376_v0 = vld [vmem:[%s522_s1] sm:$0xff]   ;;  %331 = vmatprep.subr.bf16.mxu0 %v417_v1  ;;  %351 = vmatprep.subr.bf16.mxu1 %v417_v1  ;;  %v377_v2 = vld [vmem:[%s522_s1 + $0x8] sm:$0xff]   ;;  %v378_v3 = vld [vmem:[%s522_s1 + $0x10] sm:$0xff]  }
   0x2   :  { %332 = vmatpush3.bf16.msra.mxu0 %v376_v0  ;;  %347 = vmatprep.mubr.msk.bf16.mxu0 %vm418_vm0, %v417_v1  ;;  %v385_v4 = vld [vmem:[%s524_s3] sm:$0xff]   ;;  %v379_v5 = vld [vmem:[%s522_s1 + $0x18] sm:$0xff]   ;;  %v386_v6 = vld [vmem:[%s524_s3 + $0x8] sm:$0xff]  }
   0x3   :  { %333 = vmatprep.subr.bf16.mxu0 %v417_v1  ;;  %367 = vmatprep.mubr.msk.bf16.mxu1 %vm418_vm0, %v417_v1  ;;  %v380_v7 = vld [vmem:[%s522_s1 + $0x20] sm:$0xff]   ;;  %v387_v8 = vld [vmem:[%s524_s3 + $0x10] sm:$0xff]  }
   0x4   :  { %352 = vmatpush3.bf16.msra.mxu1 %v385_v4 }
   0x5   :  { %353 = vmatprep.subr.bf16.mxu1 %v417_v1 }
   0x6   :  { %334 = vmatpush3.bf16.msra.mxu0 %v377_v2 }
   0x7   :  { %335 = vmatprep.subr.bf16.mxu0 %v417_v1 }
   0x8   :  { %354 = vmatpush3.bf16.msra.mxu1 %v386_v6 }
   0x9   :  { %355 = vmatprep.subr.bf16.mxu1 %v417_v1 }
   0xa   :  { %336 = vmatpush3.bf16.msra.mxu0 %v378_v3 }
   0xb   :  { %337 = vmatprep.subr.bf16.mxu0 %v417_v1 }
   0xe   :  { %338 = vmatpush3.bf16.msra.mxu0 %v379_v5 }
   0xf   :  { %339 = vmatprep.subr.bf16.mxu0 %v417_v1 }
  0x10   :  { %10 = vsyncpa [#allocation4], 0  ;;  %v381_v9 = vld [vmem:[%s522_s1 + $0x28] sm:$0xff]   ;;  %356 = vmatpush3.bf16.msra.mxu1 %v387_v8  ;;  %v388_v10 = vld [vmem:[%s524_s3 + $0x18] sm:$0xff]  }
  0x11   :  { %357 = vmatprep.subr.bf16.mxu1 %v417_v1  ;;  %v382_v11 = vld [vmem:[%s522_s1 + $0x30] sm:$0xff]   ;;  %v389_v12 = vld [vmem:[%s524_s3 + $0x20] sm:$0xff]   ;;  %v383_v13 = vld [vmem:[%s522_s1 + $0x38] sm:$0xff]  }
  0x12   :  { %340 = vmatpush3.bf16.msra.mxu0 %v380_v7  ;;  %v390_v14 = vld [vmem:[%s524_s3 + $0x28] sm:$0xff]   ;;  %v384_v15 = vld [vmem:[%s521_s0] sm:$0xff]   ;;  %v391_v16 = vld [vmem:[%s524_s3 + $0x30] sm:$0xff]  }
  0x13   :  { %341 = vmatprep.subr.bf16.mxu0 %v417_v1  ;;  %v392_v17 = vld [vmem:[%s524_s3 + $0x38] sm:$0xff]   ;;  %v294_v18 = vld [vmem:[%s523_s2] ss:$0 sm:$0xff]  ;;  %s419_s3 = smov [#allocation3]  }
  0x14   :  { %358 = vmatpush3.bf16.msra.mxu1 %v388_v10  ;;  %v312_v28 = vld [vmem:[%s525_s4] ss:$0 sm:$0xff]  ;;  %s283_s29 = sshll.u32 %s419_s3, 4  ;;  %s284_s29 = int_to_ptr.vmem [resolvable:$true] %s283_s29 }
  0x15   :  { %359 = vmatprep.subr.bf16.mxu1 %v417_v1  ;;  %s393_s2 = scalar_lea.vmem %s284_s29, 256  ;;  %p398_p1 = scmp.lt.s32.totalorder %s284_s29, %s284_s29 }
  0x16   :  { %342 = vmatpush3.bf16.msra.mxu0 %v381_v9  ;;  %p394_p0 = scmp.ne.s32.totalorder %s284_s29, %s393_s2  ;;  %p399_p2 = scmp.lt.s32.totalorder %s393_s2, %s393_s2 }
  0x17   :  { %343 = vmatprep.subr.bf16.mxu0 %v417_v1 }
  0x18   :  { %360 = vmatpush3.bf16.msra.mxu1 %v389_v12  ;;  %p400_p3 = por %p399_p2, %p398_p1 }
  0x19   :  { %361 = vmatprep.subr.bf16.mxu1 %v417_v1 }
  0x1a   :  { %344 = vmatpush3.bf16.msra.mxu0 %v382_v11  ;;  %p401_p4 = pnand %p400_p3, %p394_p0 }
  0x1b   :  { %345 = vmatprep.subr.bf16.mxu0 %v417_v1 }
  0x1c   :  { %362 = vmatpush3.bf16.msra.mxu1 %v390_v14 }
  0x1d   :  { %363 = vmatprep.subr.bf16.mxu1 %v417_v1 }
  0x1e   :  { %346 = vmatpush3.bf16.msra.mxu0 %v383_v13 }
  0x20   :  { %364 = vmatpush3.bf16.msra.mxu1 %v391_v16 }
  0x21   :  { %348 = vmatmul.mubr.bf16.vlgmr.msra.gmra.mrb[0].mxu0 %v384_v15  ;;  %365 = vmatprep.subr.bf16.mxu1 %v417_v1 }
  0x24   :  { %366 = vmatpush3.bf16.msra.mxu1 %v392_v17 }
  0xf4   :  { %v141_v19 = vpop.f32.mrb[0].mxu0 }
  0xf5   :  { %v142_v20 = vadd.f32 %v294_v18, %v141_v19  ;;  %v349_v21 = vpop.f32.mrb[1].mxu0 }
  0xf6   :  { %v144_v22 = vpop.f32.mrb[2].mxu0 }
  0xf7   :  { %v145_v23 = vadd.f32 %v294_v18, %v144_v22  ;;  %v350_v24 = vpop.f32.mrb[3].mxu0  ;;  %v148_v25 = vmax.f32 %v142_v20, 0.0 }
  0xf9   :  { %v149_v26 = vmax.f32 %v145_v23, 0.0 }
  0xfb   :  { %v152_v27 = vpack.c.bf16 %v149_v26, %v148_v25 }
  0xfd   :  { %368 = vmatmul.mubr.bf16.vlgmr.msra.gmra.mrb[0].mxu1 %v152_v27 }
 0x1d0   :  { %v251_v29 = vpop.f32.mrb[0].mxu1 }
 0x1d1   :  { %v274_v30 = vadd.f32 %v312_v28, %v251_v29  ;;  %v369_v31 = vpop.f32.mrb[1].mxu1 }
 0x1d2   :  { %v254_v32 = vpop.f32.mrb[2].mxu1 }
 0x1d3   :  { %276 = vst [vmem:[#allocation3] sm:$0xff] %v274_v30  ;;  %v275_v33 = vadd.f32 %v312_v28, %v254_v32  ;;  %v370_v34 = vpop.f32.mrb[3].mxu1 }
 0x1d5   :  { %277 = vst [vmem:[#allocation3 + $0x8] sm:$0xff] %v275_v33 }
 0x1d6   :  { %404 = shalt.err (!%p401_p4)
}
 0x1d7   :  { %s405_s6 = scalar_lea.hbm %s526_s5, 256 }
 0x1d8   :  { %p406_p5 = scmp.ne.s32.totalorder %s526_s5, %s405_s6  ;;  %p409_p6 = scmp.lt.u32.totalorder %s405_s6, %s526_s5 }
 0x1da   :  { %p411_p7 = pnand %p409_p6, %p406_p5 }
 0x1dc   :  { %414 = shalt.err (!%p411_p7)
}
 0x1dd   :  { %s420_s11 = smov 128   ;;  %s421_s12 = smov 8  }
 0x1de   :  { %289 = dma.vmem_to_hbm [thread:$0]  %s284_s29, 256, %s526_s5, [#allocation4], %s420_s11, %s420_s11, %s421_s12  }
 0x1df   :  { %415 = dma.done.wait [#allocation4], 256  }
 0x1e0   :  { %416 = vsyncadd [#allocation4], 4294967040 }
 0x1e1   :  { %293 = vsyncpa [#allocation4], 1 }

</bundles_post_ra>
